<compile_context>
chip_gen: v5e
topology: v5e:2x2
jax: 0.10.0
libtpu: 0.0.40
codegen_flags: <defaults>
</compile_context>

<pallas_src>
import functools

import jax
import jax.numpy as jnp
from jax.experimental import pallas as pl
from jax.experimental.pallas import tpu as pltpu

# Target bytes of *input* per grid step. Efficiency saturates well below this;
# keeping it modest leaves grid depth for megacore sharding and pipelining.
_TARGET_IN_BYTES = 8 * 1024 * 1024


def _round_up(n, m):
    return ((n + m - 1) // m) * m


def _vmem_budgets():
    """(per-step tile budget, vmem_limit cap) chosen per TPU generation."""
    try:
        kind = jax.devices()[0].device_kind.lower()
    except Exception:  # pragma: no cover - defensive fallback
        kind = ""
    if any(tag in kind for tag in ("v4", "v5", "v6")):
        # 128 MiB physical VMEM, single TensorCore per chip.
        return 64 * 1024 * 1024, 100 * 1024 * 1024
    # v7x (64 MiB physical per TC) or unknown generation: stay conservative.
    return 24 * 1024 * 1024, 44 * 1024 * 1024


def _rmsnorm_kernel(x_ref, w_ref, o_ref, *, eps, inv_h):
    x = x_ref[...]                                    # (rb, H) input dtype
    x32 = x.astype(jnp.float32)

    # mean(x^2) along the lane (hidden) axis, accumulated in f32.
    ms = jnp.sum(x32 * x32, axis=-1, keepdims=True) * inv_h     # (rb, 1)
    # eps is added OUTSIDE the sqrt — exactly the module's formula.
    denom = jnp.sqrt(ms) + eps
    # One exact reciprocal per row (divide on (rb,1)), then per-element muls.
    inv = pl.reciprocal(denom, approx=False)

    # Normalize in f32, cast back to the input dtype, then apply the weight in
    # its native dtype. Identical math for f32; avoids upcasting the weight
    # stream and halves the epilogue VPU work for bf16 inputs.
    normalized = (x32 * inv).astype(x.dtype)
    o_ref[...] = (w_ref[...] * normalized).astype(o_ref.dtype)


def internlm2_rmsnorm(hidden_states, weight, eps=1e-6):
    """hidden_states: (..., H), weight: (H,). Returns same shape/dtype as input."""
    orig_shape = hidden_states.shape
    H = orig_shape[-1]
    x2d = hidden_states.reshape(-1, H)
    R = x2d.shape[0]
    w2d = weight.reshape(1, H)

    itemsize = jnp.dtype(x2d.dtype).itemsize
    w_itemsize = jnp.dtype(w2d.dtype).itemsize
    # In-kernel f32 upcast copy only materializes for sub-f32 input dtypes.
    f32_temp_bytes = 4 if itemsize < 4 else 0

    tile_budget, vmem_cap = _vmem_budgets()

    # VMEM bytes contributed per block row: double-buffered input tile,
    # double-buffered output tile, plus the f32 upcast temporary.
    bytes_per_row = H * (2 * itemsize + 2 * itemsize + f32_temp_bytes)
    budget_rows = max(8, (tile_budget // bytes_per_row) // 8 * 8)

    # Row count that yields ~_TARGET_IN_BYTES of input per step (budget-derived,
    # not capped at a fixed 512, so small-H cases still get multi-MiB tiles).
    target_rows = max(8, (_TARGET_IN_BYTES // (H * itemsize)) // 8 * 8)

    rb = min(budget_rows, target_rows, _round_up(R, 8))
    rb = max(rb, 8)
    num_blocks = pl.cdiv(R, rb)

    # Explicit scoped-VMEM limit: the pipelined tiles + f32 temp + slack,
    # capped below each generation's physical VMEM.
    footprint = rb * bytes_per_row + 2 * H * w_itemsize + (4 << 20)
    vmem_limit = int(min(vmem_cap, max(32 * 1024 * 1024, footprint)))

    out = pl.pallas_call(
        functools.partial(_rmsnorm_kernel, eps=float(eps), inv_h=1.0 / float(H)),
        out_shape=jax.ShapeDtypeStruct((R, H), x2d.dtype),
        grid_spec=pl.GridSpec(
            grid=(num_blocks,),
            in_specs=[
                pl.BlockSpec((rb, H), lambda i: (i, 0)),
                pl.BlockSpec((1, H), lambda i: (0, 0)),
            ],
            out_specs=pl.BlockSpec((rb, H), lambda i: (i, 0)),
        ),
        compiler_params=pltpu.CompilerParams(
            dimension_semantics=("parallel",),
            vmem_limit_bytes=vmem_limit,
        ),
    )(x2d, w2d)

    return out.reshape(orig_shape)


def _reference(hidden_states, weight, eps=1e-6):
    var = jnp.mean(hidden_states * hidden_states, axis=-1, keepdims=True)
    return weight * (hidden_states / (jnp.sqrt(var) + eps))


if __name__ == "__main__":
    key = jax.random.PRNGKey(0)
    batch, seq, hidden = 2, 8, 32

    x = jax.random.normal(key, (batch, seq, hidden), dtype=jnp.float32)
    # nn.Parameter(torch.ones(hidden_size)) — deterministic init of ones.
    weight = jnp.ones((hidden,), dtype=jnp.float32)

    out = internlm2_rmsnorm(x, weight, eps=1e-6)
    out = jax.block_until_ready(out)

    ref = _reference(x, weight, eps=1e-6)
    assert out.shape == x.shape and out.dtype == x.dtype
    assert jnp.allclose(out, ref, atol=1e-5, rtol=1e-5)

    print("KERNEL_OK")
</pallas_src>

<mosaic_0001>
module attributes {stable_mosaic.version = 11 : i64} {
  func.func @_rmsnorm_kernel(%arg0: i32, %arg1: memref<16x32xf32, #tpu.memory_space<vmem>>, %arg2: memref<1x32xf32, #tpu.memory_space<vmem>>, %arg3: memref<16x32xf32, #tpu.memory_space<vmem>>) attributes {dimension_semantics = [#tpu.dimension_semantics<parallel>], iteration_bounds = array<i64: 1>, scalar_prefetch = 0 : i64, scratch_operands = 0 : i64, tpu.core_type = #tpu.core_type<tc>, window_params = [{transform_indices = @transform_0, window_bounds = array<i64: 16, 32>}, {pipeline_mode = #tpu.pipeline_mode<synchronous>, transform_indices = @transform_1, window_bounds = array<i64: 1, 32>}, {transform_indices = @transform_2, window_bounds = array<i64: 16, 32>}]} {
    %c0 = arith.constant 0 : index
    %c0_0 = arith.constant 0 : index
    %0 = vector.load %arg1[%c0, %c0_0] : memref<16x32xf32, #tpu.memory_space<vmem>>, vector<16x32xf32>
    %1 = arith.mulf %0, %0 : vector<16x32xf32>
    %cst = arith.constant dense<0.000000e+00> : vector<16xf32>
    %2 = vector.multi_reduction <add>, %1, %cst [1] : vector<16x32xf32> to vector<16xf32>
    %3 = vector.shape_cast %2 : vector<16xf32> to vector<16x1xf32>
    %cst_1 = arith.constant 3.125000e-02 : f32
    %4 = vector.broadcast %cst_1 : f32 to vector<16x1xf32>
    %5 = arith.mulf %3, %4 : vector<16x1xf32>
    %6 = math.sqrt %5 : vector<16x1xf32>
    %cst_2 = arith.constant 9.99999997E-7 : f32
    %7 = vector.broadcast %cst_2 : f32 to vector<16x1xf32>
    %8 = arith.addf %6, %7 : vector<16x1xf32>
    %9 = tpu.reciprocal %8 : vector<16x1xf32> -> vector<16x1xf32>
    %10 = vector.broadcast %9 : vector<16x1xf32> to vector<16x32xf32>
    %11 = arith.mulf %0, %10 : vector<16x32xf32>
    %c0_3 = arith.constant 0 : index
    %c0_4 = arith.constant 0 : index
    %12 = vector.load %arg2[%c0_3, %c0_4] : memref<1x32xf32, #tpu.memory_space<vmem>>, vector<1x32xf32>
    %13 = vector.broadcast %12 : vector<1x32xf32> to vector<16x32xf32>
    %14 = arith.mulf %13, %11 : vector<16x32xf32>
    %c0_5 = arith.constant 0 : index
    %c0_6 = arith.constant 0 : index
    %15 = vector.load %arg3[%c0_5, %c0_6] : memref<16x32xf32, #tpu.memory_space<vmem>>, vector<16x32xf32>
    tpu.vector_store %arg3[%c0_5, %c0_6], %14 {strides = array<i32>} : memref<16x32xf32, #tpu.memory_space<vmem>>, vector<16x32xf32>,
    return
  }
  func.func @transform_0(%arg0: i32) -> (i32, i32) {
    %c0_i32 = arith.constant 0 : i32
    %c0_i32_0 = arith.constant 0 : i32
    return %arg0, %c0_i32 : i32, i32
  }
  func.func @transform_1(%arg0: i32) -> (i32, i32) {
    %c0_i32 = arith.constant 0 : i32
    %c0_i32_0 = arith.constant 0 : i32
    %c0_i32_1 = arith.constant 0 : i32
    return %c0_i32, %c0_i32_0 : i32, i32
  }
  func.func @transform_2(%arg0: i32) -> (i32, i32) {
    %c0_i32 = arith.constant 0 : i32
    %c0_i32_0 = arith.constant 0 : i32
    return %arg0, %c0_i32 : i32, i32
  }
}

</mosaic_0001>

<bundles_post_ra>
// kernel: tpu_custom_call.1
= control target key start
LH: loop header
LB: loop body
LE: loop exit
PB: predicated region body
PF: predicated region fallthrough
CT: control target
= control target key end

     0   :  { %7 = vsyncpa [#allocation3], 0  ;;  %s275_s0 = inlined_call_operand.hbm [shape: f32[16,32], index: 0, kind: input, shape index: {}]   ;;  %s276_s1 = inlined_call_operand.hbm [shape: f32[1,32], index: 1, kind: input, shape index: {}]   ;;  %s277_s2 = inlined_call_operand.hbm [shape: f32[16,32], index: 2, kind: output, shape index: {}]  }
   0x1   :  { %8 = vsyncpa [#allocation6], 0 }
   0x2   :  { %9 = vsyncpa [#allocation4], 0  ;;  %s14_s11 = sshll.u32 %s275_s0, 4  ;;  %s231_s12 = smov [#allocation2]   ;;  %s15_s11 = int_to_ptr.hbm [resolvable:$true] %s14_s11 }
   0x3   :  { %s16_s13 = sshll.u32 %s231_s12, 4  ;;  %s28_s16 = sshll.u32 %s276_s1, 4  ;;  %s17_s13 = int_to_ptr.vmem [resolvable:$true] %s16_s13  ;;  %s29_s16 = int_to_ptr.hbm [resolvable:$true] %s28_s16 }
   0x4   :  { %s232_s17 = smov 128   ;;  %s233_s18 = smov 8  }
   0x5   :  { %22 = dma.hbm_to_vmem [thread:$0]  %s15_s11, 256, %s17_s13, [#allocation3], %s232_s17, %s232_s17, %s233_s18  }
   0x6   :  { %s234_s19 = smov [#allocation5]  }
   0x7   :  { %s30_s20 = sshll.u32 %s234_s19, 4  ;;  %s31_s20 = int_to_ptr.vmem [resolvable:$true] %s30_s20 }
   0x8   :  { %33 = dma.hbm_to_vmem [thread:$0]  %s29_s16, 16, %s31_s20, [#allocation6]  }
   0x9   :  { %225 = dma.done.wait [#allocation3], 256  }
   0xa   :  { %226 = vsyncadd [#allocation3], 4294967040 }
   0xb   :  { %227 = dma.done.wait [#allocation6], 16  }
   0xc   :  { %228 = vsyncadd [#allocation6], 4294967280  ;;  %v42_v0 = vld [vmem:[#allocation2] sm:$0xff]  ;;  %vm46_vm0 = vcmask 261120   ;;  %v260_v2 = vld [vmem:[#allocation2 + $0x8] sm:$0xff]  ;;  %s235_s0 = smov [#allocation7]  }
   0xd   :  { %v44_v1 = vmul.f32 %v42_v0, %v42_v0  ;;  %v45_v4 = vmul.f32 %v260_v2, %v260_v2  ;;  %v144_v43 = vld [vmem:[#allocation5] ss:$0 sm:$0xff]  ;;  %s123_s1 = sshll.u32 %s235_s0, 4  ;;  %s125_s23 = sshll.u32 %s277_s2, 4  ;;  %s124_s1 = int_to_ptr.vmem [resolvable:$true] %s123_s1  ;;  %s126_s23 = int_to_ptr.hbm [resolvable:$true] %s125_s23 }
   0xf   :  { %v47_v3 = vsel %vm46_vm0, %v44_v1, 0.0  ;;  %v50_v5 = vsel %vm46_vm0, %v45_v4, 0.0 }
  0x10   :  { %48 = vadd.xlane.f32.xlu0 %v47_v3 }
  0x18   :  { %51 = vadd.xlane.f32.xlu0 %v50_v5 }
  0x83   :  { %v49_v6 = vpop.xlane.xlu0 %48 }
  0x84   :  { %v53_v7 = vmul.f32 0.03125, %v49_v6 }
  0x86   :  { %145 = vrsqrt.f32 %v53_v7  ;;  %vm62_vm1 = vcmp.eq.f32.partialorder %v53_v7, inf  ;;  %v65_v20 = vand.u32 2147483648, %v53_v7  ;;  %vm64_vm2 = vcmp.eq.f32.partialorder %v53_v7, 0.0 }
  0x8b   :  { %v52_v8 = vpop.xlane.xlu0 %51 }
  0x8c   :  { %v146_v9 = vpop.eup %145  ;;  %v54_v10 = vmul.f32 0.03125, %v52_v8 }
  0x8d   :  { %v56_v11 = vmul.f32 %v146_v9, %v53_v7 }
  0x8e   :  { %147 = vrsqrt.f32 %v54_v10  ;;  %vm74_vm3 = vcmp.eq.f32.partialorder %v54_v10, inf  ;;  %v77_v28 = vand.u32 2147483648, %v54_v10  ;;  %vm76_vm4 = vcmp.eq.f32.partialorder %v54_v10, 0.0 }
  0x8f   :  { %v57_v12 = vmul.f32 %v146_v9, %v56_v11 }
  0x91   :  { %v58_v13 = vmul.f32 0.5, %v57_v12 }
  0x93   :  { %v59_v14 = vsub.f32 1.5, %v58_v13 }
  0x94   :  { %v148_v15 = vpop.eup %147 }
  0x95   :  { %v60_v16 = vmul.f32 %v146_v9, %v59_v14  ;;  %v68_v17 = vmul.f32 %v148_v15, %v54_v10 }
  0x97   :  { %v61_v18 = vmul.f32 %v60_v16, %v53_v7  ;;  %v69_v19 = vmul.f32 %v148_v15, %v68_v17 }
  0x99   :  { %v63_v21 = vsel %vm62_vm1, %v53_v7, %v61_v18  ;;  %v70_v22 = vmul.f32 0.5, %v69_v19 }
  0x9a   :  { %v66_v23 = vsel %vm64_vm2, %v65_v20, %v63_v21 }
  0x9b   :  { %v79_v24 = vadd.f32 1e-06, %v66_v23  ;;  %v71_v25 = vsub.f32 1.5, %v70_v22 }
  0x9d   :  { %149 = vrcp.f32 %v79_v24  ;;  %v72_v26 = vmul.f32 %v148_v15, %v71_v25  ;;  %v92_v35 = vand.u32 2147483648, %v79_v24  ;;  %v90_v37 = vand.u32 2147483647, %v79_v24 }
  0x9e   :  { %vm86_vm6 = vweird.f32 %v79_v24 }
  0x9f   :  { %v73_v27 = vmul.f32 %v72_v26, %v54_v10  ;;  %v93_v40 = vor.u32 1.1754944e-38, %v92_v35  ;;  %vm91_vm8 = vcmp.eq.f32.partialorder %v90_v37, 8.507059e+37 }
  0xa1   :  { %v75_v29 = vsel %vm74_vm3, %v54_v10, %v73_v27 }
  0xa2   :  { %v78_v30 = vsel %vm76_vm4, %v77_v28, %v75_v29 }
  0xa3   :  { %v150_v31 = vpop.eup %149  ;;  %v80_v32 = vadd.f32 1e-06, %v78_v30 }
  0xa4   :  { %v82_v33 = vmul.f32 %v150_v31, %v79_v24  ;;  %vm87_vm5 = vweird.f32 %v150_v31 }
  0xa5   :  { %151 = vrcp.f32 %v80_v32  ;;  %vm88_vm7 = vmor %vm86_vm6, %vm87_vm5  ;;  %v106_v47 = vand.u32 2147483648, %v80_v32  ;;  %v104_v49 = vand.u32 2147483647, %v80_v32  ;;  %vm100_vm10 = vweird.f32 %v80_v32 }
  0xa6   :  { %v83_v34 = vsub.f32 1.0, %v82_v33 }
  0xa7   :  { %v107_v52 = vor.u32 1.1754944e-38, %v106_v47  ;;  %vm105_vm12 = vcmp.eq.f32.partialorder %v104_v49, 8.507059e+37 }
  0xa8   :  { %v84_v36 = vmul.f32 %v150_v31, %v83_v34 }
  0xaa   :  { %v85_v38 = vadd.f32 %v150_v31, %v84_v36 }
  0xab   :  { %v152_v39 = vpop.eup %151 }
  0xac   :  { %v89_v41 = vsel %vm88_vm7, %v150_v31, %v85_v38  ;;  %v96_v42 = vmul.f32 %v152_v39, %v80_v32  ;;  %vm101_vm9 = vweird.f32 %v152_v39 }
  0xad   :  { %v94_v44 = vsel %vm91_vm8, %v93_v40, %v89_v41  ;;  %vm102_vm11 = vmor %vm100_vm10, %vm101_vm9 }
  0xae   :  { %v97_v45 = vsub.f32 1.0, %v96_v42  ;;  %v109_v46 = vmul.f32 %v94_v44, %v42_v0 }
  0xb0   :  { %v98_v48 = vmul.f32 %v152_v39, %v97_v45  ;;  %v115_v50 = vmul.f32 %v144_v43, %v109_v46 }
  0xb2   :  { %v99_v51 = vadd.f32 %v152_v39, %v98_v48  ;;  %117 = vst.msk [vmem:[#allocation7] sm:$0xff] %vm46_vm0, %v115_v50 }
  0xb4   :  { %v103_v53 = vsel %vm102_vm11, %v152_v39, %v99_v51 }
  0xb5   :  { %v108_v54 = vsel %vm105_vm12, %v107_v52, %v103_v53 }
  0xb6   :  { %v110_v55 = vmul.f32 %v108_v54, %v260_v2 }
  0xb8   :  { %v116_v56 = vmul.f32 %v144_v43, %v110_v55 }
  0xba   :  { %118 = vst.msk [vmem:[#allocation7 + $0x8] sm:$0xff] %vm46_vm0, %v116_v56 }
  0xbb   :  { %131 = dma.vmem_to_hbm [thread:$0]  %s124_s1, 256, %s126_s23, [#allocation4], %s232_s17, %s232_s17, %s233_s18  }
  0xbc   :  { %229 = dma.done.wait [#allocation4], 256  }
  0xbd   :  { %230 = vsyncadd [#allocation4], 4294967040 }
  0xbe   :  { %136 = vsyncpa [#allocation3], 1 }
  0xbf   :  { %137 = vsyncpa [#allocation6], 1 }
  0xc0   :  { %138 = vsyncpa [#allocation4], 1 }

</bundles_post_ra>
